<compile_context>
chip_gen: v5e
topology: v5e:2x2
jax: 0.10.0
libtpu: 0.0.40
codegen_flags: <defaults>
</compile_context>

<pallas_src>
import jax
import jax.numpy as jnp
from jax.experimental import pallas as pl
from jax.experimental.pallas import tpu as pltpu

NUM_JOINTS = 16 - 1          # 15
IN_DIM = NUM_JOINTS * 3      # 45
HID = 100
OUT = 2
LANE = 128                   # padded feature / hidden / output lane width
NEG_SLOPE = 0.01             # nn.LeakyReLU() default
MAX_TB = 512                 # batch tile; ~3.5 MiB VMEM/step << v5e 16 MiB scoped default


def _round_up(x, m):
    return ((x + m - 1) // m) * m


# ----------------------------------------------------------------------------
# Glue: pytorch3d-style quaternion_to_matrix + matrix_to_euler_angles('XYZ')
# ----------------------------------------------------------------------------
def quat_to_euler_xyz(q):
    """q: (..., 4) real-first (w, x, y, z). Returns (..., 3) XYZ euler angles."""
    r, i, j, k = q[..., 0], q[..., 1], q[..., 2], q[..., 3]
    two_s = 2.0 / jnp.sum(q * q, axis=-1)
    m00 = 1.0 - two_s * (j * j + k * k)
    m01 = two_s * (i * j - k * r)
    m02 = two_s * (i * k + j * r)
    m12 = two_s * (j * k - i * r)
    m22 = 1.0 - two_s * (i * i + j * j)
    ang_x = jnp.arctan2(-m12, m22)                       # about X
    ang_y = jnp.arcsin(jnp.clip(m02, -1.0, 1.0))         # about Y (clamped: no NaN)
    ang_z = jnp.arctan2(-m01, m00)                       # about Z
    return jnp.stack([ang_x, ang_y, ang_z], axis=-1)


# ----------------------------------------------------------------------------
# Pallas kernel: the whole MLP, one batch tile per grid step
# ----------------------------------------------------------------------------
def _leaky_relu(x):
    return jnp.where(x >= 0, x, NEG_SLOPE * x)


def discrim_kernel(x_ref,
                   w1_ref, b1_ref, w2_ref, b2_ref, w3_ref, b3_ref,
                   w4_ref, b4_ref, w5_ref, b5_ref, w6_ref, b6_ref,
                   o_ref):
    """Six (TB,128)x(128,128) bf16 MXU matmuls + LeakyReLU + residual.
    The last layer holds signed logit differences, so the 2-class softmax is a
    pure element-wise sigmoid and the output store is lane-dense (128 wide)."""

    def dense(a_f32, w_ref, b_ref):
        return (jnp.dot(a_f32.astype(jnp.bfloat16), w_ref[...],
                        preferred_element_type=jnp.float32) + b_ref[...])

    x = x_ref[...]                                       # (TB, 128) f32
    d1 = _leaky_relu(dense(x, w1_ref, b1_ref))
    d2 = _leaky_relu(dense(d1, w2_ref, b2_ref))
    d3 = _leaky_relu(dense(d2, w3_ref, b3_ref) + d1)     # residual (pre-activation add)
    d4 = dense(d3, w4_ref, b4_ref)                       # no activation (matches reference)
    d5 = _leaky_relu(dense(d4, w5_ref, b5_ref))
    zd = dense(d5, w6_ref, b6_ref)                       # lanes 0/1: z0-z1, z1-z0
    o_ref[...] = 1.0 / (1.0 + jnp.exp(-zd))              # lanes 0/1: softmax p0, p1


# ----------------------------------------------------------------------------
# Parameter preparation: pad to 128, transpose for x @ W, bf16 weights,
# convert the 2-class head to signed-difference (sigmoid) form.
# ----------------------------------------------------------------------------
def prepare_params(params):
    def pad_w(w):                       # w: (out, in)  torch layout
        out_d, in_d = w.shape
        wt = jnp.zeros((LANE, LANE), jnp.float32)
        wt = wt.at[:in_d, :out_d].set(jnp.asarray(w, jnp.float32).T)
        return wt.astype(jnp.bfloat16)

    def pad_b(b):
        bb = jnp.zeros((1, LANE), jnp.float32)
        return bb.at[0, :b.shape[0]].set(jnp.asarray(b, jnp.float32))

    (w1, b1), (w2, b2), (w3, b3), (w4, b4), (w5, b5), (w6, b6) = params
    w6d = jnp.stack([w6[0] - w6[1], w6[1] - w6[0]], axis=0)   # (2, HID)
    b6d = jnp.stack([b6[0] - b6[1], b6[1] - b6[0]])           # (2,)

    flat = []
    for w, b in ((w1, b1), (w2, b2), (w3, b3), (w4, b4), (w5, b5), (w6d, b6d)):
        flat.append(pad_w(w))
        flat.append(pad_b(b))
    return tuple(flat)


# ----------------------------------------------------------------------------
# Wrapper
# ----------------------------------------------------------------------------
def pos2d_discriminator(x_quat, kernel_params):
    """x_quat: (bs, NUM_JOINTS*4) real-first quaternions per joint -> (bs, 2)."""
    bs = x_quat.shape[0]

    # element-wise quaternion -> euler feature glue (stays in XLA)
    q = x_quat.reshape(bs * NUM_JOINTS, 4).astype(jnp.float32)
    feats = quat_to_euler_xyz(q).reshape(bs, IN_DIM)

    # pad batch to a multiple of the tile and features to 128 lanes
    tb = min(MAX_TB, _round_up(max(bs, 1), 8))
    bs_pad = _round_up(bs, tb)
    x = jnp.zeros((bs_pad, LANE), jnp.float32).at[:bs, :IN_DIM].set(feats)

    grid = (bs_pad // tb,)
    x_spec = pl.BlockSpec((tb, LANE), lambda b: (b, 0))        # pipelined over batch
    w_spec = pl.BlockSpec((LANE, LANE), lambda b: (0, 0))      # VMEM-resident weights
    b_spec = pl.BlockSpec((1, LANE), lambda b: (0, 0))
    in_specs = [x_spec] + [w_spec, b_spec] * 6
    out_spec = pl.BlockSpec((tb, LANE), lambda b: (b, 0))

    flops = 2 * bs_pad * LANE * LANE * 6
    bytes_accessed = (bs_pad * LANE * 4 * 2          # input + output
                      + 6 * LANE * LANE * 2          # bf16 weights
                      + 6 * LANE * 4)                # biases
    cost = pl.CostEstimate(flops=flops,
                           transcendentals=bs_pad * LANE,
                           bytes_accessed=bytes_accessed)

    out_pad = pl.pallas_call(
        discrim_kernel,
        out_shape=jax.ShapeDtypeStruct((bs_pad, LANE), jnp.float32),
        grid=grid,
        in_specs=in_specs,
        out_specs=out_spec,
        compiler_params=pltpu.CompilerParams(
            dimension_semantics=("parallel",)),
        cost_estimate=cost,
    )(x, *kernel_params)

    return out_pad[:bs, :OUT]


# ----------------------------------------------------------------------------
# Deterministic parameter init (PyTorch nn.Linear-style uniform, torch layout)
# ----------------------------------------------------------------------------
def init_params(key):
    dims = [(IN_DIM, HID), (HID, HID), (HID, HID), (HID, HID), (HID, HID), (HID, OUT)]
    params = []
    for fan_in, fan_out in dims:
        key, kw, kb = jax.random.split(key, 3)
        bound = 1.0 / (fan_in ** 0.5)
        w = jax.random.uniform(kw, (fan_out, fan_in), jnp.float32, -bound, bound)
        b = jax.random.uniform(kb, (fan_out,), jnp.float32, -bound, bound)
        params.append((w, b))
    return params


def reference_forward(x_quat, params):
    """Pure-JAX f32 reference mirroring the PyTorch module."""
    bs = x_quat.shape[0]
    q = x_quat.reshape(bs * NUM_JOINTS, 4).astype(jnp.float32)
    x = quat_to_euler_xyz(q).reshape(bs, IN_DIM)
    lr = lambda t: jnp.where(t >= 0, t, NEG_SLOPE * t)
    (w1, b1), (w2, b2), (w3, b3), (w4, b4), (w5, b5), (w6, b6) = params
    d1 = lr(x @ w1.T + b1)
    d2 = lr(d1 @ w2.T + b2)
    d3 = lr(d2 @ w3.T + b3 + d1)
    d4 = d3 @ w4.T + b4
    d5 = lr(d4 @ w5.T + b5)
    z = d5 @ w6.T + b6
    return jax.nn.softmax(z, axis=-1)


if __name__ == "__main__":
    key = jax.random.PRNGKey(0)
    key, kp, kx = jax.random.split(key, 3)
    params = init_params(kp)
    kernel_params = prepare_params(params)

    bs = 2
    # input: per-joint quaternions, flattened -> (bs, 15*4) = (2, 60)
    x = jax.random.normal(kx, (bs, NUM_JOINTS * 4), jnp.float32)

    out = pos2d_discriminator(x, kernel_params)
    out = jax.block_until_ready(out)

    assert out.shape == (bs, OUT)
    assert bool(jnp.all(jnp.isfinite(out)))
    # softmax rows sum to 1
    assert bool(jnp.allclose(jnp.sum(out, axis=-1), 1.0, atol=1e-5))
    # matches the f32 pure-JAX reference within bf16-MXU tolerance
    ref = reference_forward(x, params)
    assert bool(jnp.allclose(out, ref, atol=3e-2))

    print("KERNEL_OK")
</pallas_src>

<mosaic_0001>
module attributes {stable_mosaic.version = 11 : i64} {
  func.func @discrim_kernel(%arg0: i32, %arg1: memref<8x128xf32, #tpu.memory_space<vmem>>, %arg2: memref<128x128xbf16, #tpu.memory_space<vmem>>, %arg3: memref<1x128xf32, #tpu.memory_space<vmem>>, %arg4: memref<128x128xbf16, #tpu.memory_space<vmem>>, %arg5: memref<1x128xf32, #tpu.memory_space<vmem>>, %arg6: memref<128x128xbf16, #tpu.memory_space<vmem>>, %arg7: memref<1x128xf32, #tpu.memory_space<vmem>>, %arg8: memref<128x128xbf16, #tpu.memory_space<vmem>>, %arg9: memref<1x128xf32, #tpu.memory_space<vmem>>, %arg10: memref<128x128xbf16, #tpu.memory_space<vmem>>, %arg11: memref<1x128xf32, #tpu.memory_space<vmem>>, %arg12: memref<128x128xbf16, #tpu.memory_space<vmem>>, %arg13: memref<1x128xf32, #tpu.memory_space<vmem>>, %arg14: memref<8x128xf32, #tpu.memory_space<vmem>>) attributes {dimension_semantics = [#tpu.dimension_semantics<parallel>], iteration_bounds = array<i64: 1>, scalar_prefetch = 0 : i64, scratch_operands = 0 : i64, tpu.core_type = #tpu.core_type<tc>, window_params = [{transform_indices = @transform_0, window_bounds = array<i64: 8, 128>}, {pipeline_mode = #tpu.pipeline_mode<synchronous>, transform_indices = @transform_1, window_bounds = array<i64: 128, 128>}, {pipeline_mode = #tpu.pipeline_mode<synchronous>, transform_indices = @transform_2, window_bounds = array<i64: 1, 128>}, {pipeline_mode = #tpu.pipeline_mode<synchronous>, transform_indices = @transform_3, window_bounds = array<i64: 128, 128>}, {pipeline_mode = #tpu.pipeline_mode<synchronous>, transform_indices = @transform_4, window_bounds = array<i64: 1, 128>}, {pipeline_mode = #tpu.pipeline_mode<synchronous>, transform_indices = @transform_5, window_bounds = array<i64: 128, 128>}, {pipeline_mode = #tpu.pipeline_mode<synchronous>, transform_indices = @transform_6, window_bounds = array<i64: 1, 128>}, {pipeline_mode = #tpu.pipeline_mode<synchronous>, transform_indices = @transform_7, window_bounds = array<i64: 128, 128>}, {pipeline_mode = #tpu.pipeline_mode<synchronous>, transform_indices = @transform_8, window_bounds = array<i64: 1, 128>}, {pipeline_mode = #tpu.pipeline_mode<synchronous>, transform_indices = @transform_9, window_bounds = array<i64: 128, 128>}, {pipeline_mode = #tpu.pipeline_mode<synchronous>, transform_indices = @transform_10, window_bounds = array<i64: 1, 128>}, {pipeline_mode = #tpu.pipeline_mode<synchronous>, transform_indices = @transform_11, window_bounds = array<i64: 128, 128>}, {pipeline_mode = #tpu.pipeline_mode<synchronous>, transform_indices = @transform_12, window_bounds = array<i64: 1, 128>}, {transform_indices = @transform_13, window_bounds = array<i64: 8, 128>}]} {
    %c0 = arith.constant 0 : index
    %c0_0 = arith.constant 0 : index
    %0 = vector.load %arg1[%c0, %c0_0] : memref<8x128xf32, #tpu.memory_space<vmem>>, vector<8x128xf32>
    %1 = arith.truncf %0 : vector<8x128xf32> to vector<8x128xbf16>
    %c0_1 = arith.constant 0 : index
    %c0_2 = arith.constant 0 : index
    %2 = vector.load %arg2[%c0_1, %c0_2] : memref<128x128xbf16, #tpu.memory_space<vmem>>, vector<128x128xbf16>
    %cst = arith.constant dense<0.000000e+00> : vector<8x128xf32>
    %3 = tpu.matmul %1, %2, %cst {dimension_numbers = #tpu.dot_dimension_numbers<[1], [0], [0], [1], [0, 0, 1, 1], [], []>} : vector<8x128xbf16>, vector<128x128xbf16>, vector<8x128xf32> -> vector<8x128xf32>
    %c0_3 = arith.constant 0 : index
    %c0_4 = arith.constant 0 : index
    %4 = vector.load %arg3[%c0_3, %c0_4] : memref<1x128xf32, #tpu.memory_space<vmem>>, vector<1x128xf32>
    %5 = vector.broadcast %4 : vector<1x128xf32> to vector<8x128xf32>
    %6 = arith.addf %3, %5 : vector<8x128xf32>
    %cst_5 = arith.constant 0.000000e+00 : f32
    %7 = vector.broadcast %cst_5 : f32 to vector<8x128xf32>
    %8 = arith.cmpf oge, %6, %7 : vector<8x128xf32>
    %cst_6 = arith.constant 0.00999999977 : f32
    %9 = vector.broadcast %cst_6 : f32 to vector<8x128xf32>
    %10 = arith.mulf %9, %6 : vector<8x128xf32>
    %11 = arith.select %8, %6, %10 : vector<8x128xi1>, vector<8x128xf32>
    %12 = arith.truncf %11 : vector<8x128xf32> to vector<8x128xbf16>
    %c0_7 = arith.constant 0 : index
    %c0_8 = arith.constant 0 : index
    %13 = vector.load %arg4[%c0_7, %c0_8] : memref<128x128xbf16, #tpu.memory_space<vmem>>, vector<128x128xbf16>
    %cst_9 = arith.constant dense<0.000000e+00> : vector<8x128xf32>
    %14 = tpu.matmul %12, %13, %cst_9 {dimension_numbers = #tpu.dot_dimension_numbers<[1], [0], [0], [1], [0, 0, 1, 1], [], []>} : vector<8x128xbf16>, vector<128x128xbf16>, vector<8x128xf32> -> vector<8x128xf32>
    %c0_10 = arith.constant 0 : index
    %c0_11 = arith.constant 0 : index
    %15 = vector.load %arg5[%c0_10, %c0_11] : memref<1x128xf32, #tpu.memory_space<vmem>>, vector<1x128xf32>
    %16 = vector.broadcast %15 : vector<1x128xf32> to vector<8x128xf32>
    %17 = arith.addf %14, %16 : vector<8x128xf32>
    %cst_12 = arith.constant 0.000000e+00 : f32
    %18 = vector.broadcast %cst_12 : f32 to vector<8x128xf32>
    %19 = arith.cmpf oge, %17, %18 : vector<8x128xf32>
    %cst_13 = arith.constant 0.00999999977 : f32
    %20 = vector.broadcast %cst_13 : f32 to vector<8x128xf32>
    %21 = arith.mulf %20, %17 : vector<8x128xf32>
    %22 = arith.select %19, %17, %21 : vector<8x128xi1>, vector<8x128xf32>
    %23 = arith.truncf %22 : vector<8x128xf32> to vector<8x128xbf16>
    %c0_14 = arith.constant 0 : index
    %c0_15 = arith.constant 0 : index
    %24 = vector.load %arg6[%c0_14, %c0_15] : memref<128x128xbf16, #tpu.memory_space<vmem>>, vector<128x128xbf16>
    %cst_16 = arith.constant dense<0.000000e+00> : vector<8x128xf32>
    %25 = tpu.matmul %23, %24, %cst_16 {dimension_numbers = #tpu.dot_dimension_numbers<[1], [0], [0], [1], [0, 0, 1, 1], [], []>} : vector<8x128xbf16>, vector<128x128xbf16>, vector<8x128xf32> -> vector<8x128xf32>
    %c0_17 = arith.constant 0 : index
    %c0_18 = arith.constant 0 : index
    %26 = vector.load %arg7[%c0_17, %c0_18] : memref<1x128xf32, #tpu.memory_space<vmem>>, vector<1x128xf32>
    %27 = vector.broadcast %26 : vector<1x128xf32> to vector<8x128xf32>
    %28 = arith.addf %25, %27 : vector<8x128xf32>
    %29 = arith.addf %28, %11 : vector<8x128xf32>
    %cst_19 = arith.constant 0.000000e+00 : f32
    %30 = vector.broadcast %cst_19 : f32 to vector<8x128xf32>
    %31 = arith.cmpf oge, %29, %30 : vector<8x128xf32>
    %cst_20 = arith.constant 0.00999999977 : f32
    %32 = vector.broadcast %cst_20 : f32 to vector<8x128xf32>
    %33 = arith.mulf %32, %29 : vector<8x128xf32>
    %34 = arith.select %31, %29, %33 : vector<8x128xi1>, vector<8x128xf32>
    %35 = arith.truncf %34 : vector<8x128xf32> to vector<8x128xbf16>
    %c0_21 = arith.constant 0 : index
    %c0_22 = arith.constant 0 : index
    %36 = vector.load %arg8[%c0_21, %c0_22] : memref<128x128xbf16, #tpu.memory_space<vmem>>, vector<128x128xbf16>
    %cst_23 = arith.constant dense<0.000000e+00> : vector<8x128xf32>
    %37 = tpu.matmul %35, %36, %cst_23 {dimension_numbers = #tpu.dot_dimension_numbers<[1], [0], [0], [1], [0, 0, 1, 1], [], []>} : vector<8x128xbf16>, vector<128x128xbf16>, vector<8x128xf32> -> vector<8x128xf32>
    %c0_24 = arith.constant 0 : index
    %c0_25 = arith.constant 0 : index
    %38 = vector.load %arg9[%c0_24, %c0_25] : memref<1x128xf32, #tpu.memory_space<vmem>>, vector<1x128xf32>
    %39 = vector.broadcast %38 : vector<1x128xf32> to vector<8x128xf32>
    %40 = arith.addf %37, %39 : vector<8x128xf32>
    %41 = arith.truncf %40 : vector<8x128xf32> to vector<8x128xbf16>
    %c0_26 = arith.constant 0 : index
    %c0_27 = arith.constant 0 : index
    %42 = vector.load %arg10[%c0_26, %c0_27] : memref<128x128xbf16, #tpu.memory_space<vmem>>, vector<128x128xbf16>
    %cst_28 = arith.constant dense<0.000000e+00> : vector<8x128xf32>
    %43 = tpu.matmul %41, %42, %cst_28 {dimension_numbers = #tpu.dot_dimension_numbers<[1], [0], [0], [1], [0, 0, 1, 1], [], []>} : vector<8x128xbf16>, vector<128x128xbf16>, vector<8x128xf32> -> vector<8x128xf32>
    %c0_29 = arith.constant 0 : index
    %c0_30 = arith.constant 0 : index
    %44 = vector.load %arg11[%c0_29, %c0_30] : memref<1x128xf32, #tpu.memory_space<vmem>>, vector<1x128xf32>
    %45 = vector.broadcast %44 : vector<1x128xf32> to vector<8x128xf32>
    %46 = arith.addf %43, %45 : vector<8x128xf32>
    %cst_31 = arith.constant 0.000000e+00 : f32
    %47 = vector.broadcast %cst_31 : f32 to vector<8x128xf32>
    %48 = arith.cmpf oge, %46, %47 : vector<8x128xf32>
    %cst_32 = arith.constant 0.00999999977 : f32
    %49 = vector.broadcast %cst_32 : f32 to vector<8x128xf32>
    %50 = arith.mulf %49, %46 : vector<8x128xf32>
    %51 = arith.select %48, %46, %50 : vector<8x128xi1>, vector<8x128xf32>
    %52 = arith.truncf %51 : vector<8x128xf32> to vector<8x128xbf16>
    %c0_33 = arith.constant 0 : index
    %c0_34 = arith.constant 0 : index
    %53 = vector.load %arg12[%c0_33, %c0_34] : memref<128x128xbf16, #tpu.memory_space<vmem>>, vector<128x128xbf16>
    %cst_35 = arith.constant dense<0.000000e+00> : vector<8x128xf32>
    %54 = tpu.matmul %52, %53, %cst_35 {dimension_numbers = #tpu.dot_dimension_numbers<[1], [0], [0], [1], [0, 0, 1, 1], [], []>} : vector<8x128xbf16>, vector<128x128xbf16>, vector<8x128xf32> -> vector<8x128xf32>
    %c0_36 = arith.constant 0 : index
    %c0_37 = arith.constant 0 : index
    %55 = vector.load %arg13[%c0_36, %c0_37] : memref<1x128xf32, #tpu.memory_space<vmem>>, vector<1x128xf32>
    %56 = vector.broadcast %55 : vector<1x128xf32> to vector<8x128xf32>
    %57 = arith.addf %54, %56 : vector<8x128xf32>
    %cst_38 = arith.constant 0.000000e+00 : f32
    %58 = vector.broadcast %cst_38 : f32 to vector<8x128xf32>
    %59 = arith.subf %58, %57 : vector<8x128xf32>
    %60 = math.exp %59 : vector<8x128xf32>
    %cst_39 = arith.constant 1.000000e+00 : f32
    %61 = vector.broadcast %cst_39 : f32 to vector<8x128xf32>
    %62 = arith.addf %61, %60 : vector<8x128xf32>
    %cst_40 = arith.constant 1.000000e+00 : f32
    %63 = vector.broadcast %cst_40 : f32 to vector<8x128xf32>
    %64 = arith.divf %63, %62 : vector<8x128xf32>
    %c0_41 = arith.constant 0 : index
    %c0_42 = arith.constant 0 : index
    %65 = vector.load %arg14[%c0_41, %c0_42] : memref<8x128xf32, #tpu.memory_space<vmem>>, vector<8x128xf32>
    tpu.vector_store %arg14[%c0_41, %c0_42], %64 {strides = array<i32>} : memref<8x128xf32, #tpu.memory_space<vmem>>, vector<8x128xf32>,
    return
  }
  func.func @transform_0(%arg0: i32) -> (i32, i32) {
    %c0_i32 = arith.constant 0 : i32
    %c0_i32_0 = arith.constant 0 : i32
    return %arg0, %c0_i32 : i32, i32
  }
  func.func @transform_1(%arg0: i32) -> (i32, i32) {
    %c0_i32 = arith.constant 0 : i32
    %c0_i32_0 = arith.constant 0 : i32
    %c0_i32_1 = arith.constant 0 : i32
    return %c0_i32, %c0_i32_0 : i32, i32
  }
  func.func @transform_2(%arg0: i32) -> (i32, i32) {
    %c0_i32 = arith.constant 0 : i32
    %c0_i32_0 = arith.constant 0 : i32
    %c0_i32_1 = arith.constant 0 : i32
    return %c0_i32, %c0_i32_0 : i32, i32
  }
  func.func @transform_3(%arg0: i32) -> (i32, i32) {
    %c0_i32 = arith.constant 0 : i32
    %c0_i32_0 = arith.constant 0 : i32
    %c0_i32_1 = arith.constant 0 : i32
    return %c0_i32, %c0_i32_0 : i32, i32
  }
  func.func @transform_4(%arg0: i32) -> (i32, i32) {
    %c0_i32 = arith.constant 0 : i32
    %c0_i32_0 = arith.constant 0 : i32
    %c0_i32_1 = arith.constant 0 : i32
    return %c0_i32, %c0_i32_0 : i32, i32
  }
  func.func @transform_5(%arg0: i32) -> (i32, i32) {
    %c0_i32 = arith.constant 0 : i32
    %c0_i32_0 = arith.constant 0 : i32
    %c0_i32_1 = arith.constant 0 : i32
    return %c0_i32, %c0_i32_0 : i32, i32
  }
  func.func @transform_6(%arg0: i32) -> (i32, i32) {
    %c0_i32 = arith.constant 0 : i32
    %c0_i32_0 = arith.constant 0 : i32
    %c0_i32_1 = arith.constant 0 : i32
    return %c0_i32, %c0_i32_0 : i32, i32
  }
  func.func @transform_7(%arg0: i32) -> (i32, i32) {
    %c0_i32 = arith.constant 0 : i32
    %c0_i32_0 = arith.constant 0 : i32
    %c0_i32_1 = arith.constant 0 : i32
    return %c0_i32, %c0_i32_0 : i32, i32
  }
  func.func @transform_8(%arg0: i32) -> (i32, i32) {
    %c0_i32 = arith.constant 0 : i32
    %c0_i32_0 = arith.constant 0 : i32
    %c0_i32_1 = arith.constant 0 : i32
    return %c0_i32, %c0_i32_0 : i32, i32
  }
  func.func @transform_9(%arg0: i32) -> (i32, i32) {
    %c0_i32 = arith.constant 0 : i32
    %c0_i32_0 = arith.constant 0 : i32
    %c0_i32_1 = arith.constant 0 : i32
    return %c0_i32, %c0_i32_0 : i32, i32
  }
  func.func @transform_10(%arg0: i32) -> (i32, i32) {
    %c0_i32 = arith.constant 0 : i32
    %c0_i32_0 = arith.constant 0 : i32
    %c0_i32_1 = arith.constant 0 : i32
    return %c0_i32, %c0_i32_0 : i32, i32
  }
  func.func @transform_11(%arg0: i32) -> (i32, i32) {
    %c0_i32 = arith.constant 0 : i32
    %c0_i32_0 = arith.constant 0 : i32
    %c0_i32_1 = arith.constant 0 : i32
    return %c0_i32, %c0_i32_0 : i32, i32
  }
  func.func @transform_12(%arg0: i32) -> (i32, i32) {
    %c0_i32 = arith.constant 0 : i32
    %c0_i32_0 = arith.constant 0 : i32
    %c0_i32_1 = arith.constant 0 : i32
    return %c0_i32, %c0_i32_0 : i32, i32
  }
  func.func @transform_13(%arg0: i32) -> (i32, i32) {
    %c0_i32 = arith.constant 0 : i32
    %c0_i32_0 = arith.constant 0 : i32
    return %arg0, %c0_i32 : i32, i32
  }
}

</mosaic_0001>

<bundles_post_ra>
// kernel: tpu_custom_call.1
= control target key start
LH: loop header
LB: loop body
LE: loop exit
PB: predicated region body
PF: predicated region fallthrough
CT: control target
= control target key end

     0   :  { %18 = vsyncpa [#allocation3], 0  ;;  %s1300_s0 = inlined_call_operand.hbm [shape: f32[8,128], index: 0, kind: input, shape index: {}]   ;;  %s1301_s1 = inlined_call_operand.hbm [shape: bf16[128,128], index: 1, kind: input, shape index: {}]   ;;  %s1302_s2 = inlined_call_operand.vmem [shape: f32[1,128], index: 2, kind: input, shape index: {}]   ;;  %s1303_s3 = inlined_call_operand.hbm [shape: bf16[128,128], index: 3, kind: input, shape index: {}]   ;;  %s1304_s4 = inlined_call_operand.vmem [shape: f32[1,128], index: 4, kind: input, shape index: {}]   ;;  %s1305_s5 = inlined_call_operand.hbm [shape: bf16[128,128], index: 5, kind: input, shape index: {}]   ;;  %s1306_s6 = inlined_call_operand.vmem [shape: f32[1,128], index: 6, kind: input, shape index: {}]   ;;  %s1307_s7 = inlined_call_operand.hbm [shape: bf16[128,128], index: 7, kind: input, shape index: {}]   ;;  %s1308_s8 = inlined_call_operand.vmem [shape: f32[1,128], index: 8, kind: input, shape index: {}]   ;;  %s1309_s9 = inlined_call_operand.hbm [shape: bf16[128,128], index: 9, kind: input, shape index: {}]   ;;  %s1310_s10 = inlined_call_operand.vmem [shape: f32[1,128], index: 10, kind: input, shape index: {}]   ;;  %s1311_s11 = inlined_call_operand.hbm [shape: bf16[128,128], index: 11, kind: input, shape index: {}]   ;;  %s1312_s12 = inlined_call_operand.vmem [shape: f32[1,128], index: 12, kind: input, shape index: {}]   ;;  %s1313_s13 = inlined_call_operand.hbm [shape: f32[8,128], index: 13, kind: output, shape index: {}]  }
   0x1   :  { %19 = vsyncpa [#allocation6], 0 }
   0x2   :  { %20 = vsyncpa [#allocation9], 0 }
   0x3   :  { %21 = vsyncpa [#allocation12], 0  ;;  %s38_s27 = sshll.u32 %s1301_s1, 4  ;;  %s39_s27 = int_to_ptr.hbm [resolvable:$true] %s38_s27 }
   0x4   :  { %22 = vsyncpa [#allocation4], 0  ;;  %s1160_s28 = smov [#allocation5]   ;;  %s68_s15 = sshll.u32 %s1305_s5, 4  ;;  %s69_s15 = int_to_ptr.hbm [resolvable:$true] %s68_s15 }
   0x5   :  { %s40_s29 = sshll.u32 %s1160_s28, 4  ;;  %s1161_s16 = smov 64   ;;  %s41_s29 = int_to_ptr.vmem [resolvable:$true] %s40_s29 }
   0x6   :  { %s1162_s17 = smov 4   ;;  %s1163_s18 = smov [#allocation8]  }
   0x7   :  { %46 = dma.hbm_to_vmem [thread:$0]  %s39_s27, 1024, %s41_s29, [#allocation6], %s1161_s16, %s1161_s16, %s1162_s17  }
   0x8   :  { %s70_s19 = sshll.u32 %s1163_s18, 4  ;;  %s98_s21 = sshll.u32 %s1309_s9, 4  ;;  %s71_s19 = int_to_ptr.vmem [resolvable:$true] %s70_s19  ;;  %s99_s21 = int_to_ptr.hbm [resolvable:$true] %s98_s21 }
   0x9   :  { %76 = dma.hbm_to_vmem [thread:$0]  %s69_s15, 1024, %s71_s19, [#allocation9], %s1161_s16, %s1161_s16, %s1162_s17  }
   0xa   :  { %s28_s23 = sshll.u32 %s1300_s0, 4  ;;  %s1164_s24 = smov [#allocation11]   ;;  %s29_s23 = int_to_ptr.hbm [resolvable:$true] %s28_s23 }
   0xb   :  { %s100_s25 = sshll.u32 %s1164_s24, 4  ;;  %s1165_s26 = smov [#allocation2]   ;;  %s101_s25 = int_to_ptr.vmem [resolvable:$true] %s100_s25 }
   0xc   :  { %106 = dma.hbm_to_vmem [thread:$0]  %s99_s21, 1024, %s101_s25, [#allocation12], %s1161_s16, %s1161_s16, %s1162_s17  }
   0xd   :  { %s30_s9 = sshll.u32 %s1165_s26, 4  ;;  %s53_s29 = sshll.u32 %s1303_s3, 4  ;;  %s31_s9 = int_to_ptr.vmem [resolvable:$true] %s30_s9  ;;  %s54_s29 = int_to_ptr.hbm [resolvable:$true] %s53_s29 }
   0xe   :  { %33 = dma.hbm_to_vmem [thread:$0]  %s29_s23, 128, %s31_s9, [#allocation3]  }
   0xf   :  { %s83_s0 = sshll.u32 %s1307_s7, 4  ;;  %s1166_s15 = smov [#allocation7]   ;;  %s84_s0 = int_to_ptr.hbm [resolvable:$true] %s83_s0 }
  0x10   :  { %s55_s18 = sshll.u32 %s1166_s15, 4  ;;  %s1167_s19 = smov [#allocation10]   ;;  %s56_s18 = int_to_ptr.vmem [resolvable:$true] %s55_s18 }
  0x11   :  { %61 = dma.hbm_to_vmem [thread:$0]  %s54_s29, 1024, %s56_s18, [#allocation6], %s1161_s16, %s1161_s16, %s1162_s17  }
  0x12   :  { %s85_s20 = sshll.u32 %s1167_s19, 4  ;;  %s113_s3 = sshll.u32 %s1311_s11, 4  ;;  %s86_s20 = int_to_ptr.vmem [resolvable:$true] %s85_s20  ;;  %s114_s3 = int_to_ptr.hbm [resolvable:$true] %s113_s3 }
  0x13   :  { %91 = dma.hbm_to_vmem [thread:$0]  %s84_s0, 1024, %s86_s20, [#allocation9], %s1161_s16, %s1161_s16, %s1162_s17  }
  0x14   :  { %s1168_s7 = smov [#allocation13]  }
  0x15   :  { %s115_s5 = sshll.u32 %s1168_s7, 4  ;;  %s116_s5 = int_to_ptr.vmem [resolvable:$true] %s115_s5 }
  0x16   :  { %121 = dma.hbm_to_vmem [thread:$0]  %s114_s3, 1024, %s116_s5, [#allocation12], %s1161_s16, %s1161_s16, %s1162_s17  }
  0x17   :  { %1150 = dma.done.wait [#allocation3], 128  }
  0x18   :  { %1151 = vsyncadd [#allocation3], 4294967168 }
  0x19   :  { %1152 = dma.done.wait [#allocation6], 2048  }
  0x1a   :  { %1153 = vsyncadd [#allocation6], 4294965248 }
  0x1b   :  { %1154 = dma.done.wait [#allocation9], 2048  }
  0x1c   :  { %1155 = vsyncadd [#allocation9], 4294965248 }
  0x1d   :  { %1156 = dma.done.wait [#allocation12], 2048  }
  0x1e   :  { %1157 = vsyncadd [#allocation12], 4294965248  ;;  %v897_v0 = vld [vmem:[#allocation5 + $0x38] sm:$0xff]  ;;  %v896_v1 = vld [vmem:[#allocation5 + $0x30] sm:$0xff]  ;;  %s685_s28 = sshll.u32 %s1313_s13, 4  ;;  %s686_s28 = int_to_ptr.hbm [resolvable:$true] %s685_s28 }
  0x1f   :  { %222 = vmatpush.bf16.msra.mxu0 %v897_v0  ;;  %v905_v2 = vld [vmem:[#allocation7 + $0x38] sm:$0xff]  ;;  %v895_v3 = vld [vmem:[#allocation5 + $0x28] sm:$0xff]  ;;  %v904_v4 = vld [vmem:[#allocation7 + $0x30] sm:$0xff] }
  0x20   :  { %307 = vmatpush.bf16.msra.mxu1 %v905_v2  ;;  %v903_v5 = vld [vmem:[#allocation7 + $0x28] sm:$0xff]  ;;  %v894_v6 = vld [vmem:[#allocation5 + $0x20] sm:$0xff]  ;;  %v893_v8 = vld [vmem:[#allocation5 + $0x18] sm:$0xff] }
  0x21   :  { %v902_v7 = vld [vmem:[#allocation7 + $0x20] sm:$0xff]  ;;  %v901_v9 = vld [vmem:[#allocation7 + $0x18] sm:$0xff]  ;;  %v892_v10 = vld [vmem:[#allocation5 + $0x10] sm:$0xff] }
  0x22   :  { %v900_v11 = vld [vmem:[#allocation7 + $0x10] sm:$0xff]  ;;  %v891_v12 = vld [vmem:[#allocation5 + $0x8] sm:$0xff]  ;;  %v890_v13 = vld [vmem:[#allocation5] sm:$0xff] }
  0x23   :  { %223 = vmatpush.bf16.msra.mxu0 %v896_v1  ;;  %v152_v14 = vld [vmem:[#allocation2] sm:$0xff]  ;;  %v899_v16 = vld [vmem:[#allocation7 + $0x8] sm:$0xff]  ;;  %v898_v17 = vld [vmem:[#allocation7] sm:$0xff] }
  0x24   :  { %308 = vmatpush.bf16.msra.mxu1 %v904_v4  ;;  %v153_v15 = vpack.c.bf16 %v152_v14, %v152_v14  ;;  %v913_v18 = vld [vmem:[#allocation8 + $0x38] sm:$0xff]  ;;  %v912_v19 = vld [vmem:[#allocation8 + $0x30] sm:$0xff]  ;;  %v911_v20 = vld [vmem:[#allocation8 + $0x28] sm:$0xff] }
  0x25   :  { %392 = vmatpush.bf16.msra.mxu2 %v913_v18  ;;  %v910_v21 = vld [vmem:[#allocation8 + $0x20] sm:$0xff]  ;;  %v909_v22 = vld [vmem:[#allocation8 + $0x18] sm:$0xff]  ;;  %v908_v23 = vld [vmem:[#allocation8 + $0x10] sm:$0xff] }
  0x26   :  { %v948_v24 = vld [vmem:[%s1302_s2] ss:$0 sm:$0xff]  ;;  %v907_v31 = vld [vmem:[#allocation8 + $0x8] sm:$0xff]  ;;  %v906_v32 = vld [vmem:[#allocation8] sm:$0xff] }
  0x27   :  { %224 = vmatpush.bf16.msra.mxu0 %v895_v3  ;;  %v921_v33 = vld [vmem:[#allocation10 + $0x38] sm:$0xff]  ;;  %v920_v34 = vld [vmem:[#allocation10 + $0x30] sm:$0xff]  ;;  %v919_v35 = vld [vmem:[#allocation10 + $0x28] sm:$0xff] }
  0x28   :  { %309 = vmatpush.bf16.msra.mxu1 %v903_v5  ;;  %478 = vmatpush.bf16.msra.mxu3 %v921_v33  ;;  %v918_v36 = vld [vmem:[#allocation10 + $0x20] sm:$0xff]  ;;  %v917_v37 = vld [vmem:[#allocation10 + $0x18] sm:$0xff]  ;;  %v916_v38 = vld [vmem:[#allocation10 + $0x10] sm:$0xff] }
  0x29   :  { %393 = vmatpush.bf16.msra.mxu2 %v912_v19  ;;  %v949_v39 = vld [vmem:[%s1304_s4] ss:$0 sm:$0xff]  ;;  %v915_v46 = vld [vmem:[#allocation10 + $0x8] sm:$0xff]  ;;  %v914_v47 = vld [vmem:[#allocation10] sm:$0xff] }
  0x2a   :  { %v929_v48 = vld [vmem:[#allocation11 + $0x38] sm:$0xff]  ;;  %v928_v49 = vld [vmem:[#allocation11 + $0x30] sm:$0xff]  ;;  %v927_v50 = vld [vmem:[#allocation11 + $0x28] sm:$0xff] }
  0x2b   :  { %225 = vmatpush.bf16.msra.mxu0 %v894_v6  ;;  %v926_v51 = vld [vmem:[#allocation11 + $0x20] sm:$0xff]  ;;  %v925_v52 = vld [vmem:[#allocation11 + $0x18] sm:$0xff]  ;;  %v924_v53 = vld [vmem:[#allocation11 + $0x10] sm:$0xff] }
  0x2c   :  { %310 = vmatpush.bf16.msra.mxu1 %v902_v7  ;;  %479 = vmatpush.bf16.msra.mxu3 %v920_v34  ;;  %v950_v54 = vld [vmem:[%s1306_s6] ss:$0 sm:$0xff]  ;;  %v923_v56 = vld [vmem:[#allocation11 + $0x8] sm:$0xff]  ;;  %v922_v63 = vld [vmem:[#allocation11] sm:$0xff] }
  0x2d   :  { %394 = vmatpush.bf16.msra.mxu2 %v911_v20  ;;  %v937_v0 = vld [vmem:[#allocation13 + $0x38] sm:$0xff]  ;;  %v936_v1 = vld [vmem:[#allocation13 + $0x30] sm:$0xff]  ;;  %v935_v2 = vld [vmem:[#allocation13 + $0x28] sm:$0xff] }
  0x2e   :  { %v934_v3 = vld [vmem:[#allocation13 + $0x20] sm:$0xff]  ;;  %v933_v4 = vld [vmem:[#allocation13 + $0x18] sm:$0xff]  ;;  %v932_v5 = vld [vmem:[#allocation13 + $0x10] sm:$0xff] }
  0x2f   :  { %226 = vmatpush.bf16.msra.mxu0 %v893_v8  ;;  %v951_v6 = vld [vmem:[%s1308_s8] ss:$0 sm:$0xff] }
  0x30   :  { %311 = vmatpush.bf16.msra.mxu1 %v901_v9  ;;  %480 = vmatpush.bf16.msra.mxu3 %v919_v35  ;;  %v953_v20 = vld [vmem:[%s1312_s12] ss:$0 sm:$0xff] }
  0x31   :  { %395 = vmatpush.bf16.msra.mxu2 %v910_v21 }
  0x33   :  { %227 = vmatpush.bf16.msra.mxu0 %v892_v10 }
  0x34   :  { %312 = vmatpush.bf16.msra.mxu1 %v900_v11  ;;  %481 = vmatpush.bf16.msra.mxu3 %v918_v36  ;;  %v931_v11 = vld [vmem:[#allocation13 + $0x8] sm:$0xff] }
  0x35   :  { %396 = vmatpush.bf16.msra.mxu2 %v909_v22 }
  0x37   :  { %228 = vmatpush.bf16.msra.mxu0 %v891_v12  ;;  %v930_v12 = vld [vmem:[#allocation13] sm:$0xff] }
  0x38   :  { %313 = vmatpush.bf16.msra.mxu1 %v899_v16  ;;  %482 = vmatpush.bf16.msra.mxu3 %v917_v37 }
  0x39   :  { %397 = vmatpush.bf16.msra.mxu2 %v908_v23 }
  0x3b   :  { %229 = vmatpush.bf16.msra.mxu0 %v890_v13  ;;  %v952_v13 = vld [vmem:[%s1310_s10] ss:$0 sm:$0xff]  ;;  %s1169_s10 = smov [#allocation14]  }
  0x3c   :  { %314 = vmatpush.bf16.msra.mxu1 %v898_v17  ;;  %483 = vmatpush.bf16.msra.mxu3 %v916_v38  ;;  %s683_s9 = sshll.u32 %s1169_s10, 4  ;;  %s684_s9 = int_to_ptr.vmem [resolvable:$true] %s683_s9 }
  0x3d   :  { %398 = vmatpush.bf16.msra.mxu2 %v907_v31 }
  0x3e   :  { %230 = vmatmul.bf16.vlgmr.msra.gmra.mxu0 %v153_v15 }
  0x3f   :  { %560 = vmatpush.bf16.msrb.mxu0 %v929_v48 }
  0x40   :  { %484 = vmatpush.bf16.msra.mxu3 %v915_v46  ;;  %645 = vmatpush.bf16.msrb.mxu1 %v937_v0 }
  0x41   :  { %399 = vmatpush.bf16.msra.mxu2 %v906_v32 }
  0x43   :  { %561 = vmatpush.bf16.msrb.mxu0 %v928_v49 }
  0x44   :  { %485 = vmatpush.bf16.msra.mxu3 %v914_v47  ;;  %646 = vmatpush.bf16.msrb.mxu1 %v936_v1 }
  0x47   :  { %562 = vmatpush.bf16.msrb.mxu0 %v927_v50 }
  0x48   :  { %647 = vmatpush.bf16.msrb.mxu1 %v935_v2 }
  0x4b   :  { %563 = vmatpush.bf16.msrb.mxu0 %v926_v51 }
  0x4c   :  { %648 = vmatpush.bf16.msrb.mxu1 %v934_v3 }
  0x4f   :  { %564 = vmatpush.bf16.msrb.mxu0 %v925_v52 }
  0x50   :  { %649 = vmatpush.bf16.msrb.mxu1 %v933_v4 }
  0x53   :  { %565 = vmatpush.bf16.msrb.mxu0 %v924_v53 }
  0x54   :  { %650 = vmatpush.bf16.msrb.mxu1 %v932_v5 }
  0x57   :  { %566 = vmatpush.bf16.msrb.mxu0 %v923_v56 }
  0x58   :  { %651 = vmatpush.bf16.msrb.mxu1 %v931_v11 }
  0x5b   :  { %567 = vmatpush.bf16.msrb.mxu0 %v922_v63 }
  0x5c   :  { %652 = vmatpush.bf16.msrb.mxu1 %v930_v12 }
  0xbb   :  { %v231_v25 = vpop.f32.mrf.mxu0 }
  0xbc   :  { %v232_v26 = vadd.f32 %v948_v24, %v231_v25 }
  0xbe   :  { %v236_v27 = vmul.f32 0.01, %v232_v26  ;;  %vm235_vm0 = vcmp.ge.f32.partialorder %v232_v26, 0.0 }
  0xc0   :  { %v237_v28 = vsel %vm235_vm0, %v232_v26, %v236_v27 }
  0xc1   :  { %v238_v29 = vpack.c.bf16 %v237_v28, %v237_v28 }
  0xc3   :  { %v233_v30 = vpop.f32.mrf.mxu0  ;;  %315 = vmatmul.bf16.vlgmr.msra.gmra.mxu1 %v238_v29 }
 0x140   :  { %v316_v40 = vpop.f32.mrf.mxu1 }
 0x141   :  { %v317_v41 = vadd.f32 %v949_v39, %v316_v40 }
 0x143   :  { %v321_v42 = vmul.f32 0.01, %v317_v41  ;;  %vm320_vm1 = vcmp.ge.f32.partialorder %v317_v41, 0.0 }
 0x145   :  { %v322_v43 = vsel %vm320_vm1, %v317_v41, %v321_v42 }
 0x146   :  { %v323_v44 = vpack.c.bf16 %v322_v43, %v322_v43 }
 0x148   :  { %v318_v45 = vpop.f32.mrf.mxu1  ;;  %400 = vmatmul.bf16.vlgmr.msra.gmra.mxu2 %v323_v44 }
 0x1cb   :  { %v401_v55 = vpop.f32.mrf.mxu2 }
 0x1cc   :  { %v402_v57 = vadd.f32 %v950_v54, %v401_v55 }
 0x1ce   :  { %v405_v58 = vadd.f32 %v402_v57, %v237_v28 }
 0x1d0   :  { %vm406_vm2 = vcmp.ge.f32.partialorder %v405_v58, 0.0  ;;  %v407_v59 = vmul.f32 0.01, %v405_v58 }
 0x1d2   :  { %v408_v60 = vsel %vm406_vm2, %v405_v58, %v407_v59 }
 0x1d3   :  { %v403_v61 = vpop.f32.mrf.mxu2  ;;  %v409_v62 = vpack.c.bf16 %v408_v60, %v408_v60 }
 0x1d5   :  { %486 = vmatmul.bf16.vlgmr.msra.gmra.mxu3 %v409_v62 }
 0x258   :  { %v487_v7 = vpop.f32.mrf.mxu3 }
 0x259   :  { %v488_v8 = vadd.f32 %v951_v6, %v487_v7 }
 0x25b   :  { %v491_v9 = vpack.c.bf16 %v488_v8, %v488_v8 }
 0x25d   :  { %568 = vmatmul.bf16.vlgmr.msrb.gmra.mxu0 %v491_v9 }
 0x260   :  { %v489_v10 = vpop.f32.mrf.mxu3 }
 0x2da   :  { %v569_v14 = vpop.f32.mrf.mxu0 }
 0x2db   :  { %v570_v15 = vadd.f32 %v952_v13, %v569_v14 }
 0x2dd   :  { %vm573_vm3 = vcmp.ge.f32.partialorder %v570_v15, 0.0  ;;  %v574_v16 = vmul.f32 0.01, %v570_v15 }
 0x2df   :  { %v575_v17 = vsel %vm573_vm3, %v570_v15, %v574_v16 }
 0x2e0   :  { %v576_v18 = vpack.c.bf16 %v575_v17, %v575_v17 }
 0x2e2   :  { %v571_v19 = vpop.f32.mrf.mxu0  ;;  %653 = vmatmul.bf16.vlgmr.msrb.gmra.mxu1 %v576_v18 }
 0x35f   :  { %v654_v21 = vpop.f32.mrf.mxu1 }
 0x360   :  { %v655_v22 = vadd.f32 %v953_v20, %v654_v21 }
 0x362   :  { %v658_v23 = vsub.f32 0.0, %v655_v22 }
 0x364   :  { %v659_v24 = vmul.f32 1.442695, %v658_v23 }
 0x366   :  { %954 = vpow2.f32 %v659_v24 }
 0x367   :  { %v656_v25 = vpop.f32.mrf.mxu1 }
 0x36c   :  { %v955_v26 = vpop.eup %954 }
 0x36d   :  { %v661_v27 = vadd.f32 1.0, %v955_v26 }
 0x36f   :  { %956 = vrcp.f32 %v661_v27  ;;  %v673_v31 = vand.u32 2147483648, %v661_v27  ;;  %v671_v33 = vand.u32 2147483647, %v661_v27  ;;  %vm667_vm5 = vweird.f32 %v661_v27 }
 0x371   :  { %v674_v35 = vor.u32 1.1754944e-38, %v673_v31  ;;  %vm672_vm7 = vcmp.eq.f32.partialorder %v671_v33, 8.507059e+37 }
 0x375   :  { %v957_v28 = vpop.eup %956 }
 0x376   :  { %v663_v29 = vmul.f32 %v957_v28, %v661_v27  ;;  %vm668_vm4 = vweird.f32 %v957_v28 }
 0x377   :  { %vm669_vm6 = vmor %vm667_vm5, %vm668_vm4 }
 0x378   :  { %v664_v30 = vsub.f32 1.0, %v663_v29 }
 0x37a   :  { %v665_v32 = vmul.f32 %v957_v28, %v664_v30 }
 0x37c   :  { %v666_v34 = vadd.f32 %v957_v28, %v665_v32 }
 0x37e   :  { %v670_v36 = vsel %vm669_vm6, %v957_v28, %v666_v34 }
 0x37f   :  { %v675_v37 = vsel %vm672_vm7, %v674_v35, %v670_v36 }
 0x380   :  { %677 = vst [vmem:[#allocation14] sm:$0xff] %v675_v37 }
 0x381   :  { %688 = dma.vmem_to_hbm [thread:$0]  %s684_s9, 128, %s686_s28, [#allocation4]  }
 0x382   :  { %1158 = dma.done.wait [#allocation4], 128  }
 0x383   :  { %1159 = vsyncadd [#allocation4], 4294967168 }
 0x384   :  { %693 = vsyncpa [#allocation3], 1 }
 0x385   :  { %694 = vsyncpa [#allocation6], 1 }
 0x386   :  { %695 = vsyncpa [#allocation9], 1 }
 0x387   :  { %696 = vsyncpa [#allocation12], 1 }
 0x388   :  { %697 = vsyncpa [#allocation4], 1 }

</bundles_post_ra>
